<compile_context>
chip_gen: v6e
topology: v6e:2x2x1
jax: 0.10.0
libtpu: 0.0.40
codegen_flags: <defaults>
</compile_context>

<pallas_src>
import functools
import math

import jax
import jax.numpy as jnp
from jax.experimental import pallas as pl
from jax.experimental.pallas import tpu as pltpu

TARGET_ROWS = 8192  # rows of the flattened (outer*inner) axis per grid step


def _round_up(x, m):
    return ((x + m - 1) // m) * m


def _choose_tile(outer, inner, target_rows=TARGET_ROWS):
    """Pick rows-per-step = t_out * inner, a multiple of 8 (or the full extent).

    Caps t_out so the grid has >= 2 blocks whenever an aligned split exists
    (v7x megacore: a 1-block grid cannot be sharded across its two TensorCores).
    """
    m = outer * inner
    step = 8 // math.gcd(inner, 8)  # smallest t_out with (t_out * inner) % 8 == 0
    t_out = max(step, (target_rows // (inner * step)) * step)
    half = (pl.cdiv(outer, 2) // step) * step
    if half >= step and t_out > half:
        t_out = half
    if t_out >= outer:
        return outer, m  # single block equal to the full arrays (always legal)
    return t_out, t_out * inner


def _mbf_kernel(sp_ref, h1_ref, w2_ref, b2_ref, w3_ref, b3_ref, out_ref, *,
                compute_dtype):
    # spatial rows are read in their HBM dtype (f32) and cast on the VPU here,
    # avoiding a standalone XLA astype pass over the whole (m, S) array.
    sp = sp_ref[...].astype(compute_dtype)
    # fc_2 over all branches: (tile, S) @ (S, Hp) -> (tile, Hp), f32 accumulation
    h2 = jnp.dot(sp, w2_ref[...], preferred_element_type=jnp.float32) + b2_ref[...]
    # h1 (precomputed fc_1, period-`inner` rows, resident) * h2, ReLU — f32 elementwise
    h = jnp.maximum(h1_ref[...] * h2, 0.0)
    # fc_3 over all branches + sum over branches: (tile, Hp) @ (Hp, R) -> (tile, R)
    out = jnp.dot(h.astype(w3_ref.dtype), w3_ref[...],
                  preferred_element_type=jnp.float32) + b3_ref[...]
    out_ref[...] = out.astype(out_ref.dtype)


def _mbf_pallas(sp_flat, h1_tile, w2, b2, w3, b3, tile_rows, compute_dtype):
    m, s_dim = sp_flat.shape
    hp = w2.shape[1]
    r = w3.shape[1]
    grid = pl.cdiv(m, tile_rows)
    out_dtype = jnp.float32 if compute_dtype == jnp.float32 else compute_dtype

    return pl.pallas_call(
        functools.partial(_mbf_kernel, compute_dtype=compute_dtype),
        out_shape=jax.ShapeDtypeStruct((m, r), out_dtype),
        grid_spec=pltpu.PrefetchScalarGridSpec(
            num_scalar_prefetch=0,
            grid=(grid,),
            in_specs=[
                pl.BlockSpec((tile_rows, s_dim), lambda o: (o, 0)),  # spatial rows (HBM dtype)
                pl.BlockSpec((tile_rows, hp), lambda o: (0, 0)),     # pre-tiled h1 (resident)
                pl.BlockSpec((s_dim, hp), lambda o: (0, 0)),         # fused W2 (resident)
                pl.BlockSpec((1, hp), lambda o: (0, 0)),             # fused b2
                pl.BlockSpec((hp, r), lambda o: (0, 0)),             # fused W3 (resident)
                pl.BlockSpec((1, r), lambda o: (0, 0)),              # sum_c b3_c
            ],
            out_specs=pl.BlockSpec((tile_rows, r), lambda o: (o, 0)),
        ),
        compiler_params=pltpu.CompilerParams(
            dimension_semantics=("parallel",),
            vmem_limit_bytes=32 * 1024 * 1024,  # safe on v5e/v6e/v7x; usage is a few MiB
        ),
    )(sp_flat, h1_tile, w2, b2[None, :], w3, b3[None, :])


def init_params(key, appearance_size, spatial_size, representation_size, cardinality):
    sub = representation_size // cardinality
    assert sub * cardinality == representation_size, \
        "representation size must be divisible by cardinality"
    ks = jax.random.split(key, 6)
    scale = 0.1
    return dict(
        W1s=jax.random.normal(ks[0], (cardinality, appearance_size, sub), jnp.float32) * scale,
        b1s=jax.random.normal(ks[1], (cardinality, sub), jnp.float32) * scale,
        W2s=jax.random.normal(ks[2], (cardinality, spatial_size, sub), jnp.float32) * scale,
        b2s=jax.random.normal(ks[3], (cardinality, sub), jnp.float32) * scale,
        W3s=jax.random.normal(ks[4], (cardinality, sub, representation_size), jnp.float32) * scale,
        b3s=jax.random.normal(ks[5], (cardinality, representation_size), jnp.float32) * scale,
    )


def fuse_params(p, compute_dtype):
    """Fuse per-branch weights; lane-pad ONLY the hidden dim to a multiple of 128.

    The output dim R is not padded (a full-extent last dim is a legal block, and
    padding it doubles the dominant HBM write stream).  Streaming weights (W2, W3)
    are cast to compute_dtype here so the cast is not re-issued per operand build.
    """
    C, A, sub = p["W1s"].shape
    S = p["W2s"].shape[1]
    R = p["W3s"].shape[2]
    H = C * sub
    Hp = _round_up(H, 128)
    # branch c occupies hidden columns [c*sub : (c+1)*sub]
    w1 = jnp.transpose(p["W1s"], (1, 0, 2)).reshape(A, H)
    b1 = p["b1s"].reshape(H)
    w2 = jnp.transpose(p["W2s"], (1, 0, 2)).reshape(S, H)
    b2 = p["b2s"].reshape(H)
    w3 = p["W3s"].reshape(H, R)
    b3 = p["b3s"].sum(axis=0)
    # zero-padding of the hidden dim: padded cols stay exactly 0 through relu(h1*h2)
    # and the padded W3 rows are 0, so the math is unchanged.
    w1 = jnp.pad(w1, ((0, 0), (0, Hp - H)))
    b1 = jnp.pad(b1, (0, Hp - H))
    w2 = jnp.pad(w2, ((0, 0), (0, Hp - H))).astype(compute_dtype)
    b2 = jnp.pad(b2, (0, Hp - H))
    w3 = jnp.pad(w3, ((0, Hp - H), (0, 0))).astype(compute_dtype)
    return w1, b1, w2, b2, w3, b3


def message_mbf(appearance, spatial, params, node_type, compute_dtype=jnp.bfloat16):
    """JAX/Pallas equivalent of MessageMBF.forward.

    On the bf16 fast path the result is returned in bf16 (one rounding at store);
    pass compute_dtype=jnp.float32 for bit-faithful f32 math and f32 output.
    """
    n_h, n, s_dim = spatial.shape
    w1, b1, w2, b2, w3, b3 = fuse_params(params, compute_dtype)
    R = params["W3s"].shape[2]

    if node_type == "human":
        assert appearance.shape[0] == n_h, \
            "Incorrect size of dim0 for appearance features"
        outer, inner = n, n_h
        # out[i, j] pairs appearance[j] with spatial[j, i]  (fc_2(sp).permute(1,0,2))
        sp3d = jnp.transpose(spatial, (1, 0, 2))          # (n, n_h, S)
    elif node_type == "object":
        assert appearance.shape[0] == n, \
            "Incorrect size of dim0 for appearance features"
        outer, inner = n_h, n
        sp3d = spatial                                    # (n_h, n, S), no copy
    else:
        raise ValueError('Unknown node type "{}"'.format(node_type))

    # fc_1 hoisted: only `inner` rows, computed once in f32, cast to compute_dtype,
    # and tiled to exactly ONE kernel tile (period-`inner` rows) — no
    # (outer*inner)-sized broadcast of appearance in HBM.
    h1 = (jnp.dot(appearance.astype(jnp.float32), w1) + b1).astype(compute_dtype)

    t_out, tile_rows = _choose_tile(outer, inner)
    h1_tile = jnp.tile(h1, (t_out, 1))                    # (tile_rows, Hp)

    sp_flat = sp3d.reshape(outer * inner, s_dim)          # stays in its HBM dtype
    out = _mbf_pallas(sp_flat, h1_tile, w2, b2, w3, b3, tile_rows, compute_dtype)
    return out.reshape(outer, inner, R)


# ---- plain-JAX per-branch reference (mirrors the PyTorch loop) ----
def message_mbf_ref(appearance, spatial, params, node_type):
    C = params["W1s"].shape[0]
    n_h, n, _ = spatial.shape
    outs = []
    for c in range(C):
        a = appearance @ params["W1s"][c] + params["b1s"][c]
        s = spatial @ params["W2s"][c] + params["b2s"][c]
        if node_type == "human":
            a = jnp.broadcast_to(a[None], (n,) + a.shape)      # repeat(n,1,1)
            s = jnp.transpose(s, (1, 0, 2))                    # permute(1,0,2)
        else:
            a = jnp.broadcast_to(a[None], (n_h,) + a.shape)    # repeat(n_h,1,1)
        h = jax.nn.relu(a * s)
        outs.append(h @ params["W3s"][c] + params["b3s"][c])
    return sum(outs)


if __name__ == "__main__":
    appearance_size = 32
    spatial_size = 16
    representation_size = 64
    cardinality = 2

    key = jax.random.PRNGKey(0)
    (k_params, k_app_h, k_app_o, k_sp,
     k2_h, k2_o, k2_sp, k3_h, k3_o, k3_sp) = jax.random.split(key, 10)
    params = init_params(k_params, appearance_size, spatial_size,
                         representation_size, cardinality)

    # --- small case (single-block path) ---
    n_h, n = 3, 5
    spatial = jax.random.normal(k_sp, (n_h, n, spatial_size), jnp.float32)
    app_human = jax.random.normal(k_app_h, (n_h, appearance_size), jnp.float32)
    app_object = jax.random.normal(k_app_o, (n, appearance_size), jnp.float32)

    out_h = jax.block_until_ready(
        message_mbf(app_human, spatial, params, "human", compute_dtype=jnp.float32))
    out_o = jax.block_until_ready(
        message_mbf(app_object, spatial, params, "object", compute_dtype=jnp.float32))
    ref_h = message_mbf_ref(app_human, spatial, params, "human")
    ref_o = message_mbf_ref(app_object, spatial, params, "object")
    assert out_h.shape == (n, n_h, representation_size)
    assert out_o.shape == (n_h, n, representation_size)
    assert jnp.allclose(out_h, ref_h, atol=1e-4, rtol=1e-4)
    assert jnp.allclose(out_o, ref_o, atol=1e-4, rtol=1e-4)

    # bf16 fast path (default): bf16 output, looser tolerance
    out_h_bf = jax.block_until_ready(message_mbf(app_human, spatial, params, "human"))
    out_o_bf = jax.block_until_ready(message_mbf(app_object, spatial, params, "object"))
    assert out_h_bf.dtype == jnp.bfloat16 and out_o_bf.dtype == jnp.bfloat16
    assert jnp.allclose(out_h_bf.astype(jnp.float32), ref_h, atol=5e-2, rtol=5e-2)
    assert jnp.allclose(out_o_bf.astype(jnp.float32), ref_o, atol=5e-2, rtol=5e-2)

    # --- larger case: multi-step grid on both paths ---
    n_h2, n2 = 20, 64
    spatial2 = jax.random.normal(k2_sp, (n_h2, n2, spatial_size), jnp.float32)
    app_h2 = jax.random.normal(k2_h, (n_h2, appearance_size), jnp.float32)
    app_o2 = jax.random.normal(k2_o, (n2, appearance_size), jnp.float32)

    out_h2 = jax.block_until_ready(
        message_mbf(app_h2, spatial2, params, "human", compute_dtype=jnp.float32))
    out_o2 = jax.block_until_ready(
        message_mbf(app_o2, spatial2, params, "object", compute_dtype=jnp.float32))
    ref_h2 = message_mbf_ref(app_h2, spatial2, params, "human")
    ref_o2 = message_mbf_ref(app_o2, spatial2, params, "object")
    assert out_h2.shape == (n2, n_h2, representation_size)
    assert out_o2.shape == (n_h2, n2, representation_size)
    assert jnp.allclose(out_h2, ref_h2, atol=1e-4, rtol=1e-4)
    assert jnp.allclose(out_o2, ref_o2, atol=1e-4, rtol=1e-4)

    # --- regression case: ragged last grid block + inner not a multiple of 8 ---
    n_h3, n3 = 20, 250
    spatial3 = jax.random.normal(k3_sp, (n_h3, n3, spatial_size), jnp.float32)
    app_h3 = jax.random.normal(k3_h, (n_h3, appearance_size), jnp.float32)
    app_o3 = jax.random.normal(k3_o, (n3, appearance_size), jnp.float32)

    out_h3 = jax.block_until_ready(
        message_mbf(app_h3, spatial3, params, "human", compute_dtype=jnp.float32))
    out_o3 = jax.block_until_ready(
        message_mbf(app_o3, spatial3, params, "object", compute_dtype=jnp.float32))
    ref_h3 = message_mbf_ref(app_h3, spatial3, params, "human")
    ref_o3 = message_mbf_ref(app_o3, spatial3, params, "object")
    assert out_h3.shape == (n3, n_h3, representation_size)
    assert out_o3.shape == (n_h3, n3, representation_size)
    assert jnp.allclose(out_h3, ref_h3, atol=1e-4, rtol=1e-4)
    assert jnp.allclose(out_o3, ref_o3, atol=1e-4, rtol=1e-4)

    out_h3_bf = jax.block_until_ready(message_mbf(app_h3, spatial3, params, "human"))
    assert out_h3_bf.dtype == jnp.bfloat16
    assert jnp.allclose(out_h3_bf.astype(jnp.float32), ref_h3, atol=1e-1, rtol=1e-1)

    print("KERNEL_OK")
</pallas_src>

<mosaic_0001>
module attributes {stable_mosaic.version = 11 : i64} {
  func.func @_mbf_kernel(%arg0: i32, %arg1: memref<15x16xf32, #tpu.memory_space<vmem>>, %arg2: memref<15x128xf32, #tpu.memory_space<vmem>>, %arg3: memref<16x128xf32, #tpu.memory_space<vmem>>, %arg4: memref<1x128xf32, #tpu.memory_space<vmem>>, %arg5: memref<128x64xf32, #tpu.memory_space<vmem>>, %arg6: memref<1x64xf32, #tpu.memory_space<vmem>>, %arg7: memref<15x64xf32, #tpu.memory_space<vmem>>) attributes {dimension_semantics = [#tpu.dimension_semantics<parallel>], iteration_bounds = array<i64: 1>, scalar_prefetch = 0 : i64, scratch_operands = 0 : i64, tpu.core_type = #tpu.core_type<tc>, window_params = [{transform_indices = @transform_0, window_bounds = array<i64: 15, 16>}, {pipeline_mode = #tpu.pipeline_mode<synchronous>, transform_indices = @transform_1, window_bounds = array<i64: 15, 128>}, {pipeline_mode = #tpu.pipeline_mode<synchronous>, transform_indices = @transform_2, window_bounds = array<i64: 16, 128>}, {pipeline_mode = #tpu.pipeline_mode<synchronous>, transform_indices = @transform_3, window_bounds = array<i64: 1, 128>}, {pipeline_mode = #tpu.pipeline_mode<synchronous>, transform_indices = @transform_4, window_bounds = array<i64: 128, 64>}, {pipeline_mode = #tpu.pipeline_mode<synchronous>, transform_indices = @transform_5, window_bounds = array<i64: 1, 64>}, {transform_indices = @transform_6, window_bounds = array<i64: 15, 64>}]} {
    %c0 = arith.constant 0 : index
    %c0_0 = arith.constant 0 : index
    %0 = vector.load %arg1[%c0, %c0_0] : memref<15x16xf32, #tpu.memory_space<vmem>>, vector<15x16xf32>
    %c0_1 = arith.constant 0 : index
    %c0_2 = arith.constant 0 : index
    %1 = vector.load %arg3[%c0_1, %c0_2] : memref<16x128xf32, #tpu.memory_space<vmem>>, vector<16x128xf32>
    %cst = arith.constant dense<0.000000e+00> : vector<15x128xf32>
    %2 = tpu.matmul %0, %1, %cst {dimension_numbers = #tpu.dot_dimension_numbers<[1], [0], [0], [1], [0, 0, 1, 1], [], []>} : vector<15x16xf32>, vector<16x128xf32>, vector<15x128xf32> -> vector<15x128xf32>
    %c0_3 = arith.constant 0 : index
    %c0_4 = arith.constant 0 : index
    %3 = vector.load %arg4[%c0_3, %c0_4] : memref<1x128xf32, #tpu.memory_space<vmem>>, vector<1x128xf32>
    %4 = vector.broadcast %3 : vector<1x128xf32> to vector<15x128xf32>
    %5 = arith.addf %2, %4 : vector<15x128xf32>
    %c0_5 = arith.constant 0 : index
    %c0_6 = arith.constant 0 : index
    %6 = vector.load %arg2[%c0_5, %c0_6] : memref<15x128xf32, #tpu.memory_space<vmem>>, vector<15x128xf32>
    %7 = arith.mulf %6, %5 : vector<15x128xf32>
    %cst_7 = arith.constant 0.000000e+00 : f32
    %8 = vector.broadcast %cst_7 : f32 to vector<15x128xf32>
    %9 = arith.maximumf %7, %8 : vector<15x128xf32>
    %c0_8 = arith.constant 0 : index
    %c0_9 = arith.constant 0 : index
    %10 = vector.load %arg5[%c0_8, %c0_9] : memref<128x64xf32, #tpu.memory_space<vmem>>, vector<128x64xf32>
    %cst_10 = arith.constant dense<0.000000e+00> : vector<15x64xf32>
    %11 = tpu.matmul %9, %10, %cst_10 {dimension_numbers = #tpu.dot_dimension_numbers<[1], [0], [0], [1], [0, 0, 1, 1], [], []>} : vector<15x128xf32>, vector<128x64xf32>, vector<15x64xf32> -> vector<15x64xf32>
    %c0_11 = arith.constant 0 : index
    %c0_12 = arith.constant 0 : index
    %12 = vector.load %arg6[%c0_11, %c0_12] : memref<1x64xf32, #tpu.memory_space<vmem>>, vector<1x64xf32>
    %13 = vector.broadcast %12 : vector<1x64xf32> to vector<15x64xf32>
    %14 = arith.addf %11, %13 : vector<15x64xf32>
    %c0_13 = arith.constant 0 : index
    %c0_14 = arith.constant 0 : index
    %15 = vector.load %arg7[%c0_13, %c0_14] : memref<15x64xf32, #tpu.memory_space<vmem>>, vector<15x64xf32>
    tpu.vector_store %arg7[%c0_13, %c0_14], %14 {strides = array<i32>} : memref<15x64xf32, #tpu.memory_space<vmem>>, vector<15x64xf32>,
    return
  }
  func.func @transform_0(%arg0: i32) -> (i32, i32) {
    %c0_i32 = arith.constant 0 : i32
    %c0_i32_0 = arith.constant 0 : i32
    return %arg0, %c0_i32 : i32, i32
  }
  func.func @transform_1(%arg0: i32) -> (i32, i32) {
    %c0_i32 = arith.constant 0 : i32
    %c0_i32_0 = arith.constant 0 : i32
    %c0_i32_1 = arith.constant 0 : i32
    return %c0_i32, %c0_i32_0 : i32, i32
  }
  func.func @transform_2(%arg0: i32) -> (i32, i32) {
    %c0_i32 = arith.constant 0 : i32
    %c0_i32_0 = arith.constant 0 : i32
    %c0_i32_1 = arith.constant 0 : i32
    return %c0_i32, %c0_i32_0 : i32, i32
  }
  func.func @transform_3(%arg0: i32) -> (i32, i32) {
    %c0_i32 = arith.constant 0 : i32
    %c0_i32_0 = arith.constant 0 : i32
    %c0_i32_1 = arith.constant 0 : i32
    return %c0_i32, %c0_i32_0 : i32, i32
  }
  func.func @transform_4(%arg0: i32) -> (i32, i32) {
    %c0_i32 = arith.constant 0 : i32
    %c0_i32_0 = arith.constant 0 : i32
    %c0_i32_1 = arith.constant 0 : i32
    return %c0_i32, %c0_i32_0 : i32, i32
  }
  func.func @transform_5(%arg0: i32) -> (i32, i32) {
    %c0_i32 = arith.constant 0 : i32
    %c0_i32_0 = arith.constant 0 : i32
    %c0_i32_1 = arith.constant 0 : i32
    return %c0_i32, %c0_i32_0 : i32, i32
  }
  func.func @transform_6(%arg0: i32) -> (i32, i32) {
    %c0_i32 = arith.constant 0 : i32
    %c0_i32_0 = arith.constant 0 : i32
    return %arg0, %c0_i32 : i32, i32
  }
}

</mosaic_0001>

<bundles_post_ra>
// kernel: tpu_custom_call.1
= control target key start
LH: loop header
LB: loop body
LE: loop exit
PB: predicated region body
PF: predicated region fallthrough
CT: control target
= control target key end

     0   :  { %vm35_vm0 = vcmask 130048   ;;  %s447_s0 = inlined_call_operand.vmem [shape: f32[15,16], index: 0, kind: input, shape index: {}]   ;;  %s448_s1 = inlined_call_operand.vmem [shape: f32[15,128], index: 1, kind: input, shape index: {}]   ;;  %s449_s2 = inlined_call_operand.vmem [shape: f32[16,128], index: 2, kind: input, shape index: {}]   ;;  %s450_s3 = inlined_call_operand.vmem [shape: f32[1,128], index: 3, kind: input, shape index: {}]   ;;  %s451_s4 = inlined_call_operand.vmem [shape: f32[128,64], index: 4, kind: input, shape index: {}]   ;;  %s452_s5 = inlined_call_operand.vmem [shape: f32[1,64], index: 5, kind: input, shape index: {}]   ;;  %s453_s6 = inlined_call_operand.hbm [shape: f32[15,64], index: 6, kind: output, shape index: {}]  }
   0x1   :  { %v27_v0 = vld [vmem:[%s449_s2 + $0x8] sm:$0xff]  ;;  %v26_v1 = vld [vmem:[%s449_s2] sm:$0xff]  ;;  %v138_v3 = vld [vmem:[%s451_s4 + $0x78] sm:$0xff] }
   0x2   :  { %v24_v2 = vld [vmem:[%s447_s0] sm:$0xff]  ;;  %267 = vmatprep.subr.mxu0 %v27_v0  ;;  %v137_v4 = vld [vmem:[%s451_s4 + $0x70] sm:$0xff]  ;;  %v25_v5 = vld [vmem:[%s447_s0 + $0x8] sm:$0x7f]  ;;  %274 = vmatprep.subr.mxu1 %v138_v3 }
   0x3   :  { %271 = vmatprep.mubr.msk.f32.mxu0 %vm35_vm0, %v24_v2  ;;  %268 = vmatpush3.msra.mxu0 %v27_v0  ;;  %v136_v6 = vld [vmem:[%s451_s4 + $0x68] sm:$0xff]  ;;  %v135_v7 = vld [vmem:[%s451_s4 + $0x60] sm:$0xff] }
   0x4   :  { %269 = vmatprep.subr.mxu0 %v26_v1  ;;  %275 = vmatpush3.msra.mxu1 %v138_v3 }
   0x5   :  { %270 = vmatpush3.msra.mxu0 %v26_v1  ;;  %276 = vmatprep.subr.mxu1 %v137_v4 }
   0x6   :  { %272 = vmatmul.mubr.msk.f32.vlgmr.msra.gmra.mxu0 %vm35_vm0, %v25_v5  ;;  %277 = vmatpush3.msra.mxu1 %v137_v4 }
   0x7   :  { %11 = vsyncpa [#allocation3], 0  ;;  %278 = vmatprep.subr.mxu1 %v136_v6  ;;  %v134_v8 = vld [vmem:[%s451_s4 + $0x58] sm:$0xff]  ;;  %v133_v9 = vld [vmem:[%s451_s4 + $0x50] sm:$0xff]  ;;  %s334_s15 = smov [#allocation2]   ;;  %vm223_vm1 = vcmask 522240  }
   0x8   :  { %279 = vmatpush3.msra.mxu1 %v136_v6  ;;  %v132_v10 = vld [vmem:[%s451_s4 + $0x48] sm:$0xff]  ;;  %v131_v11 = vld [vmem:[%s451_s4 + $0x40] sm:$0xff]  ;;  %v130_v12 = vld [vmem:[%s451_s4 + $0x38] sm:$0xff]  ;;  %s230_s16 = sshll.u32 %s334_s15, 4  ;;  %vm221_vm2 = vcmask 523264   ;;  %s231_s16 = int_to_ptr.vmem [resolvable:$true] %s230_s16 }
   0x9   :  { %280 = vmatprep.subr.mxu1 %v135_v7  ;;  %v129_v13 = vld [vmem:[%s451_s4 + $0x30] sm:$0xff]  ;;  %v128_v14 = vld [vmem:[%s451_s4 + $0x28] sm:$0xff]  ;;  %v127_v15 = vld [vmem:[%s451_s4 + $0x20] sm:$0xff]  ;;  %p317_p1 = scmp.lt.s32.totalorder %s231_s16, %s231_s16 }
   0xa   :  { %281 = vmatpush3.msra.mxu1 %v135_v7  ;;  %v126_v16 = vld [vmem:[%s451_s4 + $0x18] sm:$0xff]  ;;  %v125_v17 = vld [vmem:[%s451_s4 + $0x10] sm:$0xff]  ;;  %v124_v18 = vld [vmem:[%s451_s4 + $0x8] sm:$0xff] }
   0xb   :  { %282 = vmatprep.subr.mxu1 %v134_v8  ;;  %v123_v19 = vld [vmem:[%s451_s4] sm:$0xff]  ;;  %v118_v23 = vld [vmem:[%s448_s1 + $0x8] sm:$0x7f] }
   0xc   :  { %283 = vmatpush3.msra.mxu1 %v134_v8  ;;  %v241_v20 = vld [vmem:[%s450_s3] ss:$0 sm:$0xff] }
   0xd   :  { %284 = vmatprep.subr.mxu1 %v133_v9  ;;  %v117_v25 = vld [vmem:[%s448_s1] sm:$0xff]  ;;  %s312_s1 = scalar_lea.vmem %s231_s16, 256 }
   0xe   :  { %285 = vmatpush3.msra.mxu1 %v133_v9  ;;  %v244_v31 = vld [vmem:[%s452_s5] ss:$0 sm:$0xff]  ;;  %p313_p0 = scmp.ne.s32.totalorder %s231_s16, %s312_s1  ;;  %p318_p2 = scmp.lt.s32.totalorder %s312_s1, %s312_s1 }
   0xf   :  { %286 = vmatprep.subr.mxu1 %v132_v10 }
  0x10   :  { %287 = vmatpush3.msra.mxu1 %v132_v10  ;;  %p319_p3 = por %p318_p2, %p317_p1 }
  0x11   :  { %288 = vmatprep.subr.mxu1 %v131_v11 }
  0x12   :  { %289 = vmatpush3.msra.mxu1 %v131_v11  ;;  %p320_p4 = pnand %p319_p3, %p313_p0 }
  0x13   :  { %290 = vmatprep.subr.mxu1 %v130_v12 }
  0x14   :  { %291 = vmatpush3.msra.mxu1 %v130_v12 }
  0x15   :  { %292 = vmatprep.subr.mxu1 %v129_v13 }
  0x16   :  { %293 = vmatpush3.msra.mxu1 %v129_v13 }
  0x17   :  { %294 = vmatprep.subr.mxu1 %v128_v14 }
  0x18   :  { %295 = vmatpush3.msra.mxu1 %v128_v14 }
  0x19   :  { %296 = vmatprep.subr.mxu1 %v127_v15 }
  0x1a   :  { %297 = vmatpush3.msra.mxu1 %v127_v15 }
  0x1b   :  { %298 = vmatprep.subr.mxu1 %v126_v16 }
  0x1c   :  { %299 = vmatpush3.msra.mxu1 %v126_v16 }
  0x1d   :  { %300 = vmatprep.subr.mxu1 %v125_v17 }
  0x1e   :  { %301 = vmatpush3.msra.mxu1 %v125_v17 }
  0x1f   :  { %302 = vmatprep.subr.mxu1 %v124_v18 }
  0x20   :  { %303 = vmatpush3.msra.mxu1 %v124_v18 }
  0x21   :  { %304 = vmatprep.subr.mxu1 %v123_v19 }
  0x22   :  { %305 = vmatpush3.msra.mxu1 %v123_v19 }
  0xc6   :  { %v273_v21 = vpop.f32.mrf.mxu0 }
  0xc7   :  { %v114_v22 = vadd.f32 %v273_v21, %v241_v20 }
  0xc8   :  { %v108_v24 = vpop.f32.mrf.mxu0 }
  0xc9   :  { %v109_v26 = vadd.f32 %v241_v20, %v108_v24  ;;  %v120_v27 = vmul.f32 %v118_v23, %v114_v22 }
  0xcb   :  { %v119_v28 = vmul.f32 %v117_v25, %v109_v26  ;;  %v122_v30 = vmax.f32 %v120_v27, 0.0 }
  0xcd   :  { %v121_v29 = vmax.f32 %v119_v28, 0.0 }
  0xcf   :  { %306 = vmatprep.mubr.f32.mxu1 %v121_v29 }
  0xd0   :  { %307 = vmatmul.mubr.f32.vlgmr.msra.gmra.mxu1 %v122_v30 }
 0x190   :  { %v308_v32 = vpop.f32.mrf.mxu1 }
 0x191   :  { %v218_v33 = vadd.f32 %v308_v32, %v244_v31 }
 0x192   :  { %v212_v34 = vpop.f32.mrf.mxu1 }
 0x193   :  { %224 = vst.msk [vmem:[#allocation2 + $0x8] sm:$0x7f] %vm223_vm1, %v218_v33  ;;  %v213_v35 = vadd.f32 %v244_v31, %v212_v34 }
 0x195   :  { %222 = vst.msk [vmem:[#allocation2] sm:$0xff] %vm221_vm2, %v213_v35 }
 0x196   :  { %323 = shalt.err (!%p320_p4)
}
 0x197   :  { %s335_s17 = smov 128   ;;  %s336_s5 = smov 8  }
 0x198   :  { %236 = dma.vmem_to_hbm [thread:$0]  %s231_s16, 256, %s453_s6, [#allocation3], %s335_s17, %s335_s17, %s336_s5  }
 0x199   :  { %332 = dma.done.wait [#allocation3], 256  }
 0x19a   :  { %333 = vsyncadd [#allocation3], 4294967040 }
 0x19b   :  { %240 = vsyncpa [#allocation3], 1 }

</bundles_post_ra>
